<compile_context>
chip_gen: v6e
topology: v6e:2x2x1
jax: 0.10.0
libtpu: 0.0.40
codegen_flags: <defaults>
</compile_context>

<pallas_src>
import functools
import math

import jax
import jax.numpy as jnp
from jax.experimental import pallas as pl
from jax.experimental.pallas import tpu as pltpu

# ---- Module constants (from main.py) --------------------------------------
BOX = 1                      # "B" in the PyTorch module
S = 30
SS = S * S                   # 900
FEAT = SS * BOX * 5          # 4500 flattened features per sample

# ---- Kernel layout constants -----------------------------------------------
LANES = 125                  # 25 groups of 5 per row; 4500 = 36 * 125
ROWS_PER_SAMPLE = FEAT // LANES   # 36
MAX_BLOCK_ROWS = 512         # rows per grid step (multiple of 8)


def _yolo_loss_kernel(scale, mask_ref, yp_ref, yt_ref, out_ref, acc_ref):
    """One grid step over a block of rows.

    mask_ref : (1, LANES) f32 0/1 confidence mask (same block every step)
    yp_ref   : (block_rows, LANES) f32
    yt_ref   : (block_rows, LANES) f32
    out_ref  : (1, 1) f32 SMEM output
    acc_ref  : (1, 1) f32 SMEM scratch accumulator
    """
    i = pl.program_id(0)

    @pl.when(i == 0)
    def _():
        acc_ref[0, 0] = 0.0

    d = yp_ref[...] - yt_ref[...]
    # Single fmul mask instead of an iota/mod/cmp/select chain.
    acc_ref[0, 0] += jnp.sum(d * d * mask_ref[...])

    @pl.when(i == pl.num_programs(0) - 1)
    def _():
        out_ref[0, 0] = acc_ref[0, 0] * scale


def yolo_loss(y_pred, y_true):
    """Live path of YoloLoss.forward: 0.5 * mean_b(sum_cells((p_conf - t_conf)^2)).

    y_pred, y_true: (batch, 4500) float32 (same flat layout the PyTorch .view uses).
    """
    batch = y_pred.shape[0]
    total_rows = batch * ROWS_PER_SAMPLE

    # Sublane/lane-dense slab; free reshape of contiguous data.
    yp = y_pred.reshape(total_rows, LANES).astype(jnp.float32)
    yt = y_true.reshape(total_rows, LANES).astype(jnp.float32)

    if total_rows <= MAX_BLOCK_ROWS:
        block_rows = total_rows          # single step; block == full array dims
        padded_rows = total_rows
    else:
        block_rows = MAX_BLOCK_ROWS
        padded_rows = math.ceil(total_rows / block_rows) * block_rows
        pad = padded_rows - total_rows
        if pad:
            # Pad both inputs identically with zeros -> diff == 0 on padding.
            yp = jnp.pad(yp, ((0, pad), (0, 0)))
            yt = jnp.pad(yt, ((0, pad), (0, 0)))

    num_steps = padded_rows // block_rows

    # Confidence channel = lane index 4 mod 5 within each row of 25 groups.
    conf_mask = ((jnp.arange(LANES) % 5) == 4).astype(jnp.float32).reshape(1, LANES)

    scale = 0.5 / batch  # trace-time constant, independent of the slab reshape
    total_elems = total_rows * LANES

    out = pl.pallas_call(
        functools.partial(_yolo_loss_kernel, scale),
        out_shape=jax.ShapeDtypeStruct((1, 1), jnp.float32),
        grid_spec=pltpu.PrefetchScalarGridSpec(
            num_scalar_prefetch=0,
            grid=(num_steps,),
            in_specs=[
                # mask: constant block index -> DMA'd once, reused every step
                pl.BlockSpec((1, LANES), lambda i: (0, 0)),
                pl.BlockSpec((block_rows, LANES), lambda i: (i, 0)),   # y_pred rows
                pl.BlockSpec((block_rows, LANES), lambda i: (i, 0)),   # y_true rows
            ],
            out_specs=pl.BlockSpec((1, 1), lambda i: (0, 0),
                                   memory_space=pltpu.MemorySpace.SMEM),
            scratch_shapes=[pltpu.SMEM((1, 1), jnp.float32)],
        ),
        compiler_params=pltpu.CompilerParams(
            dimension_semantics=("arbitrary",),
        ),
        cost_estimate=pl.CostEstimate(
            flops=3 * total_elems,
            transcendentals=0,
            bytes_accessed=2 * total_elems * 4 + 4,
        ),
    )(conf_mask, yp, yt)
    return out[0, 0]


def yolo_loss_ref(y_pred, y_true):
    """Plain-JAX reference of the live path of the PyTorch forward."""
    batch = y_pred.shape[0]
    yp = y_pred.reshape(batch, SS, BOX, 5)
    yt = y_true.reshape(batch, SS, BOX, 5)
    p_conf = yp[:, :, :, 4].reshape(batch, -1)
    t_conf = yt[:, :, :, 4].reshape(batch, -1)
    return 0.5 * jnp.mean(jnp.sum((p_conf - t_conf) ** 2, axis=1))


if __name__ == "__main__":
    key = jax.random.PRNGKey(0)

    # Small test (single grid step): module implies (-1, SS, B, 5) -> (2, 4500)
    k1, k2 = jax.random.split(key)
    batch = 2
    y_pred = jax.random.normal(k1, (batch, FEAT), dtype=jnp.float32)
    y_true = jax.random.uniform(k2, (batch, FEAT), dtype=jnp.float32)

    loss = jax.block_until_ready(yolo_loss(y_pred, y_true))
    ref = jax.block_until_ready(yolo_loss_ref(y_pred, y_true))
    assert jnp.isfinite(loss), "non-finite loss"
    assert jnp.allclose(loss, ref, rtol=1e-5, atol=1e-5), (loss, ref)

    # Larger test to exercise the multi-step pipelined grid + row padding path.
    k3, k4 = jax.random.split(k2)
    batch2 = 40  # total_rows = 1440 > 512 -> 3 grid steps, 96 padded rows
    y_pred2 = jax.random.normal(k3, (batch2, FEAT), dtype=jnp.float32)
    y_true2 = jax.random.uniform(k4, (batch2, FEAT), dtype=jnp.float32)

    loss2 = jax.block_until_ready(yolo_loss(y_pred2, y_true2))
    ref2 = jax.block_until_ready(yolo_loss_ref(y_pred2, y_true2))
    assert jnp.isfinite(loss2), "non-finite loss (large batch)"
    assert jnp.allclose(loss2, ref2, rtol=1e-5, atol=1e-5), (loss2, ref2)

    print("KERNEL_OK")
</pallas_src>

<mosaic_0001>
module attributes {stable_mosaic.version = 11 : i64} {
  func.func @_yolo_loss_kernel(%arg0: i32, %arg1: memref<1x125xf32, #tpu.memory_space<vmem>>, %arg2: memref<72x125xf32, #tpu.memory_space<vmem>>, %arg3: memref<72x125xf32, #tpu.memory_space<vmem>>, %arg4: memref<1x1xf32, #tpu.memory_space<smem>>, %arg5: memref<1x1xf32, #tpu.memory_space<smem>>) attributes {dimension_semantics = [#tpu.dimension_semantics<arbitrary>], iteration_bounds = array<i64: 1>, scalar_prefetch = 0 : i64, scratch_operands = 1 : i64, tpu.core_type = #tpu.core_type<tc>, window_params = [{pipeline_mode = #tpu.pipeline_mode<synchronous>, transform_indices = @transform_0, window_bounds = array<i64: 1, 125>}, {transform_indices = @transform_1, window_bounds = array<i64: 72, 125>}, {transform_indices = @transform_2, window_bounds = array<i64: 72, 125>}, {transform_indices = @transform_3, window_bounds = array<i64: 1, 1>}]} {
    %c0_i32 = arith.constant 0 : i32
    %0 = arith.cmpi eq, %arg0, %c0_i32 : i32
    %1 = arith.extui %0 : i1 to i32
    %c0_i32_0 = arith.constant 0 : i32
    %2 = arith.cmpi ne, %1, %c0_i32_0 : i32
    scf.if %2 {
      %cst_12 = arith.constant 0.000000e+00 : f32
      %c0_13 = arith.constant 0 : index
      %c0_14 = arith.constant 0 : index
      %20 = memref.load %arg5[%c0_13, %c0_14] : memref<1x1xf32, #tpu.memory_space<smem>>
      memref.store %cst_12, %arg5[%c0_13, %c0_14] : memref<1x1xf32, #tpu.memory_space<smem>>
    } else {
    }
    %c0 = arith.constant 0 : index
    %c0_1 = arith.constant 0 : index
    %3 = vector.load %arg2[%c0, %c0_1] : memref<72x125xf32, #tpu.memory_space<vmem>>, vector<72x125xf32>
    %c0_2 = arith.constant 0 : index
    %c0_3 = arith.constant 0 : index
    %4 = vector.load %arg3[%c0_2, %c0_3] : memref<72x125xf32, #tpu.memory_space<vmem>>, vector<72x125xf32>
    %5 = arith.subf %3, %4 : vector<72x125xf32>
    %c0_4 = arith.constant 0 : index
    %c0_5 = arith.constant 0 : index
    %6 = memref.load %arg5[%c0_4, %c0_5] : memref<1x1xf32, #tpu.memory_space<smem>>
    %7 = arith.mulf %5, %5 : vector<72x125xf32>
    %c0_6 = arith.constant 0 : index
    %c0_7 = arith.constant 0 : index
    %8 = vector.load %arg1[%c0_6, %c0_7] : memref<1x125xf32, #tpu.memory_space<vmem>>, vector<1x125xf32>
    %9 = vector.broadcast %8 : vector<1x125xf32> to vector<72x125xf32>
    %10 = arith.mulf %7, %9 : vector<72x125xf32>
    %11 = vector.shape_cast %10 : vector<72x125xf32> to vector<1x72x125xf32>
    %cst = arith.constant dense<0.000000e+00> : vector<1xf32>
    %12 = vector.multi_reduction <add>, %11, %cst [1, 2] : vector<1x72x125xf32> to vector<1xf32>
    %13 = vector.shape_cast %12 : vector<1xf32> to vector<1x1x1xf32>
    %14 = vector.extract %13[0, 0, 0] : f32 from vector<1x1x1xf32>
    %15 = arith.addf %6, %14 : f32
    %c0_8 = arith.constant 0 : index
    %c0_9 = arith.constant 0 : index
    %16 = memref.load %arg5[%c0_8, %c0_9] : memref<1x1xf32, #tpu.memory_space<smem>>
    memref.store %15, %arg5[%c0_8, %c0_9] : memref<1x1xf32, #tpu.memory_space<smem>>
    %c0_i32_10 = arith.constant 0 : i32
    %17 = arith.cmpi eq, %arg0, %c0_i32_10 : i32
    %18 = arith.extui %17 : i1 to i32
    %c0_i32_11 = arith.constant 0 : i32
    %19 = arith.cmpi ne, %18, %c0_i32_11 : i32
    scf.if %19 {
      %c0_12 = arith.constant 0 : index
      %c0_13 = arith.constant 0 : index
      %20 = memref.load %arg5[%c0_12, %c0_13] : memref<1x1xf32, #tpu.memory_space<smem>>
      %cst_14 = arith.constant 2.500000e-01 : f32
      %21 = arith.mulf %20, %cst_14 : f32
      %c0_15 = arith.constant 0 : index
      %c0_16 = arith.constant 0 : index
      %22 = memref.load %arg4[%c0_15, %c0_16] : memref<1x1xf32, #tpu.memory_space<smem>>
      memref.store %21, %arg4[%c0_15, %c0_16] : memref<1x1xf32, #tpu.memory_space<smem>>
    } else {
    }
    return
  }
  func.func @transform_0(%arg0: i32) -> (i32, i32) {
    %c0_i32 = arith.constant 0 : i32
    %c0_i32_0 = arith.constant 0 : i32
    %c0_i32_1 = arith.constant 0 : i32
    return %c0_i32, %c0_i32_0 : i32, i32
  }
  func.func @transform_1(%arg0: i32) -> (i32, i32) {
    %c0_i32 = arith.constant 0 : i32
    %c0_i32_0 = arith.constant 0 : i32
    return %arg0, %c0_i32 : i32, i32
  }
  func.func @transform_2(%arg0: i32) -> (i32, i32) {
    %c0_i32 = arith.constant 0 : i32
    %c0_i32_0 = arith.constant 0 : i32
    return %arg0, %c0_i32 : i32, i32
  }
  func.func @transform_3(%arg0: i32) -> (i32, i32) {
    %c0_i32 = arith.constant 0 : i32
    %c0_i32_0 = arith.constant 0 : i32
    %c0_i32_1 = arith.constant 0 : i32
    return %c0_i32, %c0_i32_0 : i32, i32
  }
}

</mosaic_0001>

<bundles_post_ra>
// kernel: tpu_custom_call.1
= control target key start
LH: loop header
LB: loop body
LE: loop exit
PB: predicated region body
PF: predicated region fallthrough
CT: control target
= control target key end

     0   :  { %8 = vsyncpa [#allocation4], 0  ;;  %s295_s0 = inlined_call_operand.hbm [shape: f32[1,125], index: 0, kind: input, shape index: {}]   ;;  %s296_s1 = inlined_call_operand.hbm [shape: f32[72,125], index: 1, kind: input, shape index: {}]   ;;  %s297_s2 = inlined_call_operand.hbm [shape: f32[72,125], index: 2, kind: input, shape index: {}]   ;;  %s298_s3 = inlined_call_operand.hbm [shape: f32[1,1], index: 3, kind: output, shape index: {}]  }
   0x1   :  { %9 = vsyncpa [#allocation7], 0 }
   0x2   :  { %10 = vsyncpa [#allocation5], 0  ;;  %s248_s12 = smov [#allocation6]  }
   0x3   :  { %s26_s13 = sshll.u32 %s248_s12, 4  ;;  %s27_s13 = int_to_ptr.vmem [resolvable:$true] %s26_s13 }
   0x4   :  { %s182_s14 = scalar_lea.vmem %s27_s13, 1152  ;;  %p187_p1 = scmp.lt.s32.totalorder %s27_s13, %s27_s13 }
   0x5   :  { %p183_p0 = scmp.ne.s32.totalorder %s27_s13, %s182_s14  ;;  %p188_p2 = scmp.lt.s32.totalorder %s182_s14, %s182_s14 }
   0x7   :  { %p189_p3 = por %p188_p2, %p187_p1 }
   0x9   :  { %p190_p4 = pnand %p189_p3, %p183_p0 }
   0xb   :  { %193 = shalt.err (!%p190_p4)
}
   0xc   :  { %s249_s15 = smov 128   ;;  %s250_s16 = smov 8  }
   0xd   :  { %32 = dma.hbm_to_vmem [thread:$0]  %s296_s1, 1152, %s27_s13, [#allocation7], %s249_s15, %s249_s15, %s250_s16  }
   0xe   :  { %s251_s19 = smov [#allocation3]   ;;  %s252_s21 = smov [#allocation8]  }
   0xf   :  { %s17_s20 = sshll.u32 %s251_s19, 4  ;;  %s38_s22 = sshll.u32 %s252_s21, 4  ;;  %s18_s20 = int_to_ptr.vmem [resolvable:$true] %s17_s20  ;;  %s39_s22 = int_to_ptr.vmem [resolvable:$true] %s38_s22 }
  0x10   :  { %s202_s23 = scalar_lea.vmem %s18_s20, 16  ;;  %s206_s24 = scalar_lea.vmem %s18_s20, 32 }
  0x11   :  { %p203_p5 = scmp.ne.s32.totalorder %s18_s20, %s202_s23  ;;  %p207_p6 = scmp.lt.s32.totalorder %s18_s20, %s18_s20 }
  0x12   :  { %p208_p7 = scmp.lt.s32.totalorder %s206_s24, %s202_s23 }
  0x14   :  { %p209_p8 = por %p208_p7, %p207_p6 }
  0x16   :  { %p210_p9 = pnand %p209_p8, %p203_p5 }
  0x18   :  { %213 = shalt.err (!%p210_p9)
}
  0x19   :  { %20 = dma.hbm_to_vmem [thread:$0]  %s295_s0, 16, %s18_s20, [#allocation4]  }
  0x1a   :  { %s222_s27 = scalar_lea.vmem %s39_s22, 1152  ;;  %p227_p11 = scmp.lt.s32.totalorder %s39_s22, %s39_s22 }
  0x1b   :  { %p223_p10 = scmp.ne.s32.totalorder %s39_s22, %s222_s27  ;;  %p228_p12 = scmp.lt.s32.totalorder %s222_s27, %s222_s27 }
  0x1d   :  { %p229_p13 = por %p228_p12, %p227_p11 }
  0x1f   :  { %p230_p0 = pnand %p229_p13, %p223_p10 }
  0x21   :  { %233 = shalt.err (!%p230_p0)
}
  0x22   :  { %44 = dma.hbm_to_vmem [thread:$0]  %s297_s2, 1152, %s39_s22, [#allocation7], %s249_s15, %s249_s15, %s250_s16  }
  0x23   :  { %242 = dma.done.wait [#allocation4], 16  }
  0x24   :  { %243 = vsyncadd [#allocation4], 4294967280 }
  0x25   :  { %244 = dma.done.wait [#allocation7], 2304  }
  0x26   :  { %245 = vsyncadd [#allocation7], 4294964992  ;;  %v60_v0 = vld [vmem:[#allocation6] sm:$0xff]  ;;  %v61_v1 = vld [vmem:[#allocation6 + $0x8] sm:$0xff]  ;;  %vm113_vm0 = vcmask 1022976   ;;  %s253_s29 = smov [#allocation9]  }
  0x27   :  { %v62_v2 = vld [vmem:[#allocation6 + $0x10] sm:$0xff]  ;;  %v63_v3 = vld [vmem:[#allocation6 + $0x18] sm:$0xff]  ;;  %v64_v4 = vld [vmem:[#allocation6 + $0x20] sm:$0xff] }
  0x28   :  { %v65_v5 = vld [vmem:[#allocation6 + $0x28] sm:$0xff]  ;;  %v66_v6 = vld [vmem:[#allocation6 + $0x30] sm:$0xff]  ;;  %v71_v9 = vld [vmem:[#allocation8 + $0x10] sm:$0xff] }
  0x29   :  { %v69_v7 = vld [vmem:[#allocation8] sm:$0xff]  ;;  %v70_v8 = vld [vmem:[#allocation8 + $0x8] sm:$0xff]  ;;  %v72_v10 = vld [vmem:[#allocation8 + $0x18] sm:$0xff]  ;;  %v80_v15 = vsub.f32 %v62_v2, %v71_v9 }
  0x2a   :  { %v73_v11 = vld [vmem:[#allocation8 + $0x20] sm:$0xff]  ;;  %v74_v12 = vld [vmem:[#allocation8 + $0x28] sm:$0xff]  ;;  %v78_v13 = vsub.f32 %v60_v0, %v69_v7  ;;  %v79_v14 = vsub.f32 %v61_v1, %v70_v8  ;;  %v67_v16 = vld [vmem:[#allocation6 + $0x38] sm:$0xff]  ;;  %v81_v19 = vsub.f32 %v63_v3, %v72_v10 }
  0x2b   :  { %v75_v17 = vld [vmem:[#allocation8 + $0x30] sm:$0xff]  ;;  %v76_v18 = vld [vmem:[#allocation8 + $0x38] sm:$0xff]  ;;  %v82_v20 = vsub.f32 %v64_v4, %v73_v11  ;;  %v83_v21 = vsub.f32 %v65_v5, %v74_v12  ;;  %v77_v26 = vld [vmem:[#allocation8 + $0x40] sm:$0xff]  ;;  %v90_v28 = vmul.f32 %v80_v15, %v80_v15 }
  0x2c   :  { %v84_v22 = vsub.f32 %v66_v6, %v75_v17  ;;  %v88_v23 = vmul.f32 %v78_v13, %v78_v13  ;;  %v165_v24 = vld [vmem:[#allocation3] ss:$0 sm:$0xff]  ;;  %v68_v25 = vld [vmem:[#allocation6 + $0x40] sm:$0xff]  ;;  %v89_v27 = vmul.f32 %v79_v14, %v79_v14  ;;  %v91_v29 = vmul.f32 %v81_v19, %v81_v19 }
  0x2d   :  { %v92_v30 = vmul.f32 %v82_v20, %v82_v20  ;;  %v85_v31 = vsub.f32 %v67_v16, %v76_v18  ;;  %v93_v32 = vmul.f32 %v83_v21, %v83_v21  ;;  %v106_v35 = vmul.f32 %v165_v24, %v90_v28 }
  0x2e   :  { %v104_v33 = vmul.f32 %v165_v24, %v88_v23  ;;  %v105_v34 = vmul.f32 %v165_v24, %v89_v27  ;;  %v107_v36 = vmul.f32 %v165_v24, %v91_v29  ;;  %v86_v37 = vsub.f32 %v68_v25, %v77_v26 }
  0x2f   :  { %v94_v38 = vmul.f32 %v84_v22, %v84_v22  ;;  %v108_v39 = vmul.f32 %v165_v24, %v92_v30  ;;  %v117_v42 = vsel %vm113_vm0, %v106_v35, 0.0  ;;  %v95_v44 = vmul.f32 %v85_v31, %v85_v31 }
  0x30   :  { %v114_v40 = vsel %vm113_vm0, %v104_v33, 0.0  ;;  %v115_v41 = vsel %vm113_vm0, %v105_v34, 0.0  ;;  %v109_v45 = vmul.f32 %v165_v24, %v93_v32  ;;  %v119_v46 = vsel %vm113_vm0, %v107_v36, 0.0 }
  0x31   :  { %v116_v43 = vadd.f32 %v115_v41, %v114_v40  ;;  %v96_v48 = vmul.f32 %v86_v37, %v86_v37  ;;  %v110_v49 = vmul.f32 %v165_v24, %v94_v38  ;;  %v121_v50 = vsel %vm113_vm0, %v108_v39, 0.0 }
  0x32   :  { %v111_v52 = vmul.f32 %v165_v24, %v95_v44  ;;  %v123_v53 = vsel %vm113_vm0, %v109_v45, 0.0 }
  0x33   :  { %v118_v47 = vadd.f32 %v117_v42, %v116_v43  ;;  %v112_v55 = vmul.f32 %v165_v24, %v96_v48  ;;  %v125_v56 = vsel %vm113_vm0, %v110_v49, 0.0 }
  0x34   :  { %v127_v58 = vsel %vm113_vm0, %v111_v52, 0.0 }
  0x35   :  { %v120_v51 = vadd.f32 %v119_v46, %v118_v47  ;;  %v129_v60 = vsel %vm113_vm0, %v112_v55, 0.0 }
  0x37   :  { %v122_v54 = vadd.f32 %v121_v50, %v120_v51 }
  0x39   :  { %v124_v57 = vadd.f32 %v123_v53, %v122_v54 }
  0x3b   :  { %v126_v59 = vadd.f32 %v125_v56, %v124_v57 }
  0x3d   :  { %v128_v61 = vadd.f32 %v127_v58, %v126_v59 }
  0x3f   :  { %v130_v62 = vadd.f32 %v129_v60, %v128_v61 }
  0x41   :  { %131 = vadd.xlane.f32.xlu0 %v130_v62 }
  0xca   :  { %v132_v63 = vpop.xlane.xlu0 %131 }
  0xcb   :  { %v133_v0 = vrot.slane %v132_v63, 4 }
  0xcd   :  { %v134_v1 = vadd.f32 %v133_v0, %v132_v63 }
  0xcf   :  { %v135_v2 = vrot.slane %v134_v1, 2 }
  0xd1   :  { %v136_v3 = vadd.f32 %v135_v2, %v134_v1 }
  0xd3   :  { %v137_v4 = vrot.slane %v136_v3, 1 }
  0xd5   :  { %v138_v5 = vadd.f32 %v137_v4, %v136_v3 }
  0xd7   :  { %166 = vpush %v138_v5 }
 0x108   :  { %s167_s0 = spop %166 }
 0x109   :  { %s147_s2 = smul.f32 0.25, %s167_s0 }
 0x10b   :  { %149 = sst [smem:[#allocation9]] %s147_s2 }
 0x10c   :  { %157 = dma.smem_to_hbm %s253_s29, 16, %s298_s3, [#allocation5]  }
 0x10d   :  { %246 = dma.done.wait [#allocation5], 16  }
 0x10e   :  { %247 = vsyncadd [#allocation5], 4294967280 }
 0x10f   :  { %161 = sfence }
 0x110   :  { %162 = vsyncpa [#allocation4], 1 }
 0x111   :  { %163 = vsyncpa [#allocation7], 1 }
 0x112   :  { %164 = vsyncpa [#allocation5], 1 }

</bundles_post_ra>
